<compile_context>
chip_gen: v7x
topology: tpu7x:2x2x1
jax: 0.10.0
libtpu: 0.0.40
codegen_flags: <defaults>
</compile_context>

<pallas_src>
import jax
import jax.numpy as jnp
from jax import lax
from jax.experimental import pallas as pl
from jax.experimental.pallas import tpu as pltpu


_LANE = 128      # hidden dim padded to a multiple of the lane width
_SUBLANE = 8     # f32 sublane tile


def _round_up(x, m):
    return (x + m - 1) // m * m


def _swap_leading(v):
    """(A, B, C) -> (B, A, C); lane dim untouched, runs on the XLU."""
    if hasattr(pltpu, "einshape"):
        return pltpu.einshape("abc->bac", v)
    return jnp.swapaxes(v, 0, 1)


def _vmem_capacity_bytes():
    try:
        if hasattr(pltpu, "get_tpu_info"):
            cap = getattr(pltpu.get_tpu_info(), "vmem_capacity_bytes", None)
            if cap:
                return int(cap)
    except Exception:
        pass
    return 64 * 1024 * 1024      # conservative: assume the smallest (v7x) VMEM


def _mingru_kernel(x_ref, w_ref, b_ref, h0_ref, out_ref, a_sc, b_sc, hcarry_sc):
    # x_ref    : (b_blk, s_chunk, d_in)   batch-major input block
    # w_ref    : (d_in, 2*H)              fused [W_z | W_h]
    # b_ref    : (1, 2*H)                 fused [b_z | b_h] (f32)
    # h0_ref   : (b_blk, H)               initial hidden state (f32)
    # out_ref  : (b_blk, s_chunk, H)      batch-major output block
    # a_sc     : VMEM (sub, b_blk, H) f32   a_t = 1 - z_t
    # b_sc     : VMEM (sub, b_blk, H) f32   b_t = z_t*h_tilde_t, overwritten with h_t
    # hcarry_sc: VMEM (b_blk, H) f32        hidden state carried across seq chunks
    b_blk, s_chunk, d_in = x_ref.shape
    hidden = out_ref.shape[-1]
    sub = a_sc.shape[0]
    n_sub = s_chunk // sub

    # Initialize the carried hidden state at the first sequence chunk of this batch block.
    @pl.when(pl.program_id(1) == 0)
    def _():
        hcarry_sc[...] = h0_ref[...].astype(jnp.float32)

    bias = b_ref[...]                               # hoisted out of the sub-chunk loop

    def sub_body(k, h):
        start = pl.multiple_of(k * sub, sub)

        # ---- Vectorized pre-pass: one fused MXU matmul -> a_t, b_t ------------------
        x_sub = x_ref[:, pl.ds(start, sub), :]                      # (b_blk, sub, d_in)
        proj = jnp.dot(x_sub.reshape(b_blk * sub, d_in), w_ref[...],
                       preferred_element_type=jnp.float32) + bias   # (b_blk*sub, 2H)
        # (batch, time) -> (time, batch) once per sub-chunk (XLU), lane split 128-aligned.
        proj = _swap_leading(proj.reshape(b_blk, sub, 2 * hidden))  # (sub, b_blk, 2H)
        z = jax.nn.sigmoid(proj[..., :hidden])
        a_sc[...] = 1.0 - z
        b_sc[...] = z * proj[..., hidden:]

        # ---- Serial recurrence: h = a[t]*h + b[t]; unrolled so a/b loads hide -------
        def step(t, h_prev):
            h_t = a_sc[t] * h_prev + b_sc[t]
            b_sc[t] = h_t                            # dense f32 store, no cast
            return h_t

        h = lax.fori_loop(0, sub, step, h, unroll=8)

        # ---- One dense, lane-aligned cast+store per sub-chunk -----------------------
        out_ref[:, pl.ds(start, sub), :] = (
            _swap_leading(b_sc[...]).astype(out_ref.dtype))
        return h

    hcarry_sc[...] = lax.fori_loop(0, n_sub, sub_body, hcarry_sc[...])


def mingru_forward(x, w_z, b_z, w_h, b_h, h0=None, *, max_seq_chunk=512):
    """x: (B,S,D_in); w_*: (D_in,H); b_*: (H,); h0: (B,1,H) or None.  Returns (B,S,H)."""
    b, s, d_in = x.shape
    h = w_z.shape[1]
    if h0 is None:
        h0 = jnp.zeros((b, 1, h), dtype=jnp.float32)

    h_pad = _round_up(h, _LANE)
    itemsize = jnp.dtype(x.dtype).itemsize
    w_item = jnp.dtype(w_z.dtype).itemsize

    # --- Batch block: bigger -> more independent vregs per serial step, but keep the
    #     h carry small and keep >=2 batch blocks when the batch allows (megacore). ---
    b8 = _round_up(b, _SUBLANE)
    if b8 >= 128:
        b_blk = 32
    elif b8 >= 32:
        b_blk = 16
    else:
        b_blk = 8
    while b_blk > 8 and b_blk * h_pad * 4 > 64 * 1024:   # carry <= ~16 f32 vregs
        b_blk //= 2
    b_pad = _round_up(b, b_blk)

    # --- Generation-aware VMEM budgeting (v7x: 64 MiB, v5e/v6e: 128 MiB physical). ---
    vmem_cap = _vmem_capacity_bytes()
    vmem_limit = max(16 * 2**20, min(vmem_cap // 2, 64 * 2**20))
    budget = vmem_limit // 2                      # target for blocks + scratch

    fixed = (2 * d_in * 2 * h_pad * w_item        # double-buffered fused weight block
             + 2 * 2 * h_pad * 4                  # bias
             + 2 * b_blk * h_pad * 4              # h0 block
             + b_blk * h_pad * 4)                 # persistent h carry

    def _down8(v):
        return max(_SUBLANE, v // _SUBLANE * _SUBLANE)

    # Sub-chunk length: bounds a/b scratch + projection/sigmoid temporaries.
    sub = _down8(min(max(512 // b_blk, _SUBLANE), 64, _round_up(s, _SUBLANE)))

    def _inner_bytes(n):   # a_sc + b_sc + proj/transpose/z temporaries (worst case)
        return n * b_blk * (10 * h_pad + 2 * d_in) * 4

    while sub > _SUBLANE and fixed + _inner_bytes(sub) > budget // 2:
        sub = _down8(sub // 2)

    # HBM<->VMEM chunk length: dominated by double-buffered x / out blocks.
    per_t = 2 * b_blk * (d_in + h_pad) * itemsize
    room = max(budget - fixed - _inner_bytes(sub), per_t * sub)
    s_chunk = min(max_seq_chunk, max(sub, room // per_t))
    s_chunk = max(sub, s_chunk // sub * sub)
    s_chunk = min(s_chunk, _round_up(s, sub))
    s_pad = _round_up(s, s_chunk)

    # --- Fused, lane-padded weights: [W_z | W_h] and [b_z | b_h]. ---
    w_fused = jnp.zeros((d_in, 2 * h_pad), dtype=w_z.dtype)
    w_fused = w_fused.at[:, :h].set(w_z).at[:, h_pad:h_pad + h].set(w_h)
    b_fused = jnp.zeros((1, 2 * h_pad), dtype=jnp.float32)
    b_fused = b_fused.at[0, :h].set(b_z.astype(jnp.float32))
    b_fused = b_fused.at[0, h_pad:h_pad + h].set(b_h.astype(jnp.float32))

    # Batch-major padded activations (zero padding is benign: sigmoid(0) decays a 0 carry).
    x_p = jnp.pad(x, ((0, b_pad - b), (0, s_pad - s), (0, 0)))
    h0_p = jnp.pad(h0[:, 0, :].astype(jnp.float32),
                   ((0, b_pad - b), (0, h_pad - h)))          # keep the carry init in f32

    n_b = b_pad // b_blk
    n_s = s_pad // s_chunk

    flops = 2 * b_pad * s_pad * d_in * (2 * h_pad) + 5 * b_pad * s_pad * h_pad
    bytes_accessed = (x_p.size * itemsize + w_fused.size * w_item
                      + b_pad * s_pad * h_pad * itemsize)

    out = pl.pallas_call(
        _mingru_kernel,
        out_shape=jax.ShapeDtypeStruct((b_pad, s_pad, h_pad), x.dtype),
        grid_spec=pltpu.PrefetchScalarGridSpec(
            num_scalar_prefetch=0,
            grid=(n_b, n_s),
            in_specs=[
                pl.BlockSpec((b_blk, s_chunk, d_in), lambda i, j: (i, j, 0)),   # x
                pl.BlockSpec((d_in, 2 * h_pad), lambda i, j: (0, 0)),           # [W_z|W_h]
                pl.BlockSpec((1, 2 * h_pad), lambda i, j: (0, 0)),              # [b_z|b_h]
                pl.BlockSpec((b_blk, h_pad), lambda i, j: (i, 0)),              # h0
            ],
            out_specs=pl.BlockSpec((b_blk, s_chunk, h_pad), lambda i, j: (i, j, 0)),
            scratch_shapes=[
                pltpu.VMEM((sub, b_blk, h_pad), jnp.float32),   # a_t
                pltpu.VMEM((sub, b_blk, h_pad), jnp.float32),   # b_t / h_t
                pltpu.VMEM((b_blk, h_pad), jnp.float32),        # h carry across chunks
            ],
        ),
        compiler_params=pltpu.CompilerParams(
            dimension_semantics=("parallel", "arbitrary"),
            vmem_limit_bytes=int(vmem_limit)),
        cost_estimate=pl.CostEstimate(
            flops=flops,
            transcendentals=b_pad * s_pad * h_pad,
            bytes_accessed=bytes_accessed),
    )(x_p, w_fused, b_fused, h0_p)

    return out[:b, :s, :h]


def mingru_reference(x, w_z, b_z, w_h, b_h, h0=None):
    """Pure-JAX reference mirroring the PyTorch sequential forward."""
    b, s, d_in = x.shape
    h = w_z.shape[1]
    if h0 is None:
        h0 = jnp.zeros((b, 1, h), dtype=jnp.float32)
    z = jax.nn.sigmoid(jnp.einsum("bsd,dh->bsh", x, w_z) + b_z)
    h_tilde = jnp.einsum("bsd,dh->bsh", x, w_h) + b_h

    def step(h_prev, inputs):
        z_t, ht_t = inputs
        h_t = (1.0 - z_t) * h_prev + z_t * ht_t
        return h_t, h_t

    _, hs = lax.scan(step, h0[:, 0, :].astype(jnp.float32),
                     (jnp.swapaxes(z, 0, 1), jnp.swapaxes(h_tilde, 0, 1)))
    return jnp.swapaxes(hs, 0, 1)


def _make_params(key, d_in, hidden):
    kwz, kbz, kwh, kbh = jax.random.split(key, 4)
    bound = 1.0 / (d_in ** 0.5)   # nn.Linear's U(-1/sqrt(fan_in), 1/sqrt(fan_in))
    w_z = jax.random.uniform(kwz, (d_in, hidden), jnp.float32, -bound, bound)
    b_z = jax.random.uniform(kbz, (hidden,), jnp.float32, -bound, bound)
    w_h = jax.random.uniform(kwh, (d_in, hidden), jnp.float32, -bound, bound)
    b_h = jax.random.uniform(kbh, (hidden,), jnp.float32, -bound, bound)
    return w_z, b_z, w_h, b_h


if __name__ == "__main__":
    key = jax.random.PRNGKey(0)
    kp, kx1, kh1, kx2, kh2 = jax.random.split(key, 5)

    # --- Small primary test: B=2, S=8, D_in=16, H=32 (h0=None and explicit h0). ---
    B, S, D_IN, H = 2, 8, 16, 32
    w_z, b_z, w_h, b_h = _make_params(kp, D_IN, H)
    x = jax.random.normal(kx1, (B, S, D_IN), jnp.float32)
    h0 = jax.random.normal(kh1, (B, 1, H), jnp.float32)

    out = jax.block_until_ready(mingru_forward(x, w_z, b_z, w_h, b_h))
    ref = mingru_reference(x, w_z, b_z, w_h, b_h)
    assert out.shape == (B, S, H)
    assert jnp.allclose(out, ref, atol=1e-5, rtol=1e-5), "mismatch vs reference (h0=None)"

    out2 = jax.block_until_ready(mingru_forward(x, w_z, b_z, w_h, b_h, h0))
    ref2 = mingru_reference(x, w_z, b_z, w_h, b_h, h0)
    assert jnp.allclose(out2, ref2, atol=1e-5, rtol=1e-5), "mismatch vs reference (h0)"

    # --- Slightly larger test exercising batch blocks, sub-chunk carry and the
    #     cross-chunk hidden-state carry (grid = (2, 2), n_sub = 2) plus padding. ---
    B2, S2 = 10, 136
    x2 = jax.random.normal(kx2, (B2, S2, D_IN), jnp.float32)
    h02 = jax.random.normal(kh2, (B2, 1, H), jnp.float32)
    out3 = jax.block_until_ready(
        mingru_forward(x2, w_z, b_z, w_h, b_h, h02, max_seq_chunk=128))
    ref3 = mingru_reference(x2, w_z, b_z, w_h, b_h, h02)
    assert out3.shape == (B2, S2, H)
    assert jnp.allclose(out3, ref3, atol=1e-4, rtol=1e-4), "mismatch vs reference (multi-chunk)"

    print("KERNEL_OK")
</pallas_src>

<mosaic_0001>
module attributes {stable_mosaic.version = 11 : i64} {
  func.func @_mingru_kernel(%arg0: i32, %arg1: i32, %arg2: memref<8x8x16xf32, #tpu.memory_space<vmem>>, %arg3: memref<16x256xf32, #tpu.memory_space<vmem>>, %arg4: memref<1x256xf32, #tpu.memory_space<vmem>>, %arg5: memref<8x128xf32, #tpu.memory_space<vmem>>, %arg6: memref<8x8x128xf32, #tpu.memory_space<vmem>>, %arg7: memref<8x8x128xf32, #tpu.memory_space<vmem>>, %arg8: memref<8x8x128xf32, #tpu.memory_space<vmem>>, %arg9: memref<8x128xf32, #tpu.memory_space<vmem>>) attributes {dimension_semantics = [#tpu.dimension_semantics<parallel>, #tpu.dimension_semantics<arbitrary>], iteration_bounds = array<i64: 1, 1>, scalar_prefetch = 0 : i64, scratch_operands = 3 : i64, tpu.core_type = #tpu.core_type<tc>, window_params = [{transform_indices = @transform_0, window_bounds = array<i64: 8, 8, 16>}, {pipeline_mode = #tpu.pipeline_mode<synchronous>, transform_indices = @transform_1, window_bounds = array<i64: 16, 256>}, {pipeline_mode = #tpu.pipeline_mode<synchronous>, transform_indices = @transform_2, window_bounds = array<i64: 1, 256>}, {transform_indices = @transform_3, window_bounds = array<i64: 8, 128>}, {transform_indices = @transform_4, window_bounds = array<i64: 8, 8, 128>}]} {
    %c0_i32 = arith.constant 0 : i32
    %0 = arith.cmpi eq, %arg1, %c0_i32 : i32
    %1 = arith.extui %0 : i1 to i32
    %c0_i32_0 = arith.constant 0 : i32
    %2 = arith.cmpi ne, %1, %c0_i32_0 : i32
    scf.if %2 {
      %c0_75 = arith.constant 0 : index
      %c0_76 = arith.constant 0 : index
      %129 = vector.load %arg5[%c0_75, %c0_76] : memref<8x128xf32, #tpu.memory_space<vmem>>, vector<8x128xf32>
      %c0_77 = arith.constant 0 : index
      %c0_78 = arith.constant 0 : index
      %130 = vector.load %arg9[%c0_77, %c0_78] : memref<8x128xf32, #tpu.memory_space<vmem>>, vector<8x128xf32>
      tpu.vector_store %arg9[%c0_77, %c0_78], %129 {strides = array<i32>} : memref<8x128xf32, #tpu.memory_space<vmem>>, vector<8x128xf32>,
    } else {
    }
    %c0 = arith.constant 0 : index
    %c0_1 = arith.constant 0 : index
    %3 = vector.load %arg4[%c0, %c0_1] : memref<1x256xf32, #tpu.memory_space<vmem>>, vector<1x256xf32>
    %c0_2 = arith.constant 0 : index
    %c0_3 = arith.constant 0 : index
    %4 = vector.load %arg9[%c0_2, %c0_3] : memref<8x128xf32, #tpu.memory_space<vmem>>, vector<8x128xf32>
    %c0_i32_4 = arith.constant 0 : i32
    %c8_i32 = arith.constant 8 : i32
    %5 = arith.muli %c0_i32_4, %c8_i32 : i32
    %6 = tpu.assume_multiple %5, 8 : i32
    %c0_5 = arith.constant 0 : index
    %7 = arith.index_cast %6 : i32 to index
    %c0_6 = arith.constant 0 : index
    %8 = vector.load %arg2[%c0_5, %7, %c0_6] : memref<8x8x16xf32, #tpu.memory_space<vmem>>, vector<8x8x16xf32>
    %9 = vector.shape_cast %8 : vector<8x8x16xf32> to vector<64x16xf32>
    %c0_7 = arith.constant 0 : index
    %c0_8 = arith.constant 0 : index
    %10 = vector.load %arg3[%c0_7, %c0_8] : memref<16x256xf32, #tpu.memory_space<vmem>>, vector<16x256xf32>
    %cst = arith.constant dense<0.000000e+00> : vector<64x256xf32>
    %11 = tpu.matmul %9, %10, %cst {dimension_numbers = #tpu.dot_dimension_numbers<[1], [0], [0], [1], [0, 0, 1, 1], [], []>} : vector<64x16xf32>, vector<16x256xf32>, vector<64x256xf32> -> vector<64x256xf32>
    %12 = vector.broadcast %3 : vector<1x256xf32> to vector<64x256xf32>
    %13 = arith.addf %11, %12 : vector<64x256xf32>
    %14 = vector.shape_cast %13 : vector<64x256xf32> to vector<8x8x256xf32>
    %15 = tpu.transpose %14, [1, 0, 2] : vector<8x8x256xf32> -> vector<8x8x256xf32>
    %16 = vector.extract_strided_slice %15 {offsets = [0, 0, 0], sizes = [8, 8, 128], strides = [1, 1, 1]} : vector<8x8x256xf32> to vector<8x8x128xf32>
    %17 = arith.negf %16 : vector<8x8x128xf32>
    %18 = math.exp %17 : vector<8x8x128xf32>
    %cst_9 = arith.constant 1.000000e+00 : f32
    %19 = vector.broadcast %cst_9 : f32 to vector<8x8x128xf32>
    %20 = arith.addf %19, %18 : vector<8x8x128xf32>
    %21 = arith.divf %19, %20 : vector<8x8x128xf32>
    %cst_10 = arith.constant 1.000000e+00 : f32
    %22 = vector.broadcast %cst_10 : f32 to vector<8x8x128xf32>
    %23 = arith.subf %22, %21 : vector<8x8x128xf32>
    %c0_11 = arith.constant 0 : index
    %c0_12 = arith.constant 0 : index
    %c0_13 = arith.constant 0 : index
    %24 = vector.load %arg7[%c0_11, %c0_12, %c0_13] : memref<8x8x128xf32, #tpu.memory_space<vmem>>, vector<8x8x128xf32>
    tpu.vector_store %arg7[%c0_11, %c0_12, %c0_13], %23 {strides = array<i32>} : memref<8x8x128xf32, #tpu.memory_space<vmem>>, vector<8x8x128xf32>,
    %25 = vector.extract_strided_slice %15 {offsets = [0, 0, 128], sizes = [8, 8, 128], strides = [1, 1, 1]} : vector<8x8x256xf32> to vector<8x8x128xf32>
    %26 = arith.mulf %21, %25 : vector<8x8x128xf32>
    %c0_14 = arith.constant 0 : index
    %c0_15 = arith.constant 0 : index
    %c0_16 = arith.constant 0 : index
    %27 = vector.load %arg8[%c0_14, %c0_15, %c0_16] : memref<8x8x128xf32, #tpu.memory_space<vmem>>, vector<8x8x128xf32>
    tpu.vector_store %arg8[%c0_14, %c0_15, %c0_16], %26 {strides = array<i32>} : memref<8x8x128xf32, #tpu.memory_space<vmem>>, vector<8x8x128xf32>,
    %c0_i32_17 = arith.constant 0 : i32
    %28 = arith.index_cast %c0_i32_17 : i32 to index
    %c0_18 = arith.constant 0 : index
    %c0_19 = arith.constant 0 : index
    %29 = vector.load %arg7[%28, %c0_18, %c0_19] : memref<8x8x128xf32, #tpu.memory_space<vmem>>, vector<1x8x128xf32>
    %30 = vector.shape_cast %29 : vector<1x8x128xf32> to vector<8x128xf32>
    %31 = arith.mulf %30, %4 : vector<8x128xf32>
    %32 = arith.index_cast %c0_i32_17 : i32 to index
    %c0_20 = arith.constant 0 : index
    %c0_21 = arith.constant 0 : index
    %33 = vector.load %arg8[%32, %c0_20, %c0_21] : memref<8x8x128xf32, #tpu.memory_space<vmem>>, vector<1x8x128xf32>
    %34 = vector.shape_cast %33 : vector<1x8x128xf32> to vector<8x128xf32>
    %35 = arith.addf %31, %34 : vector<8x128xf32>
    %36 = arith.index_cast %c0_i32_17 : i32 to index
    %c0_22 = arith.constant 0 : index
    %c0_23 = arith.constant 0 : index
    %37 = vector.load %arg8[%36, %c0_22, %c0_23] : memref<8x8x128xf32, #tpu.memory_space<vmem>>, vector<1x8x128xf32>
    %38 = vector.shape_cast %37 : vector<1x8x128xf32> to vector<8x128xf32>
    %39 = vector.shape_cast %35 : vector<8x128xf32> to vector<1x8x128xf32>
    tpu.vector_store %arg8[%36, %c0_22, %c0_23], %39 {strides = array<i32>} : memref<8x8x128xf32, #tpu.memory_space<vmem>>, vector<1x8x128xf32>,
    %c1_i32 = arith.constant 1 : i32
    %40 = arith.index_cast %c1_i32 : i32 to index
    %c0_24 = arith.constant 0 : index
    %c0_25 = arith.constant 0 : index
    %41 = vector.load %arg7[%40, %c0_24, %c0_25] : memref<8x8x128xf32, #tpu.memory_space<vmem>>, vector<1x8x128xf32>
    %42 = vector.shape_cast %41 : vector<1x8x128xf32> to vector<8x128xf32>
    %43 = arith.mulf %42, %35 : vector<8x128xf32>
    %44 = arith.index_cast %c1_i32 : i32 to index
    %c0_26 = arith.constant 0 : index
    %c0_27 = arith.constant 0 : index
    %45 = vector.load %arg8[%44, %c0_26, %c0_27] : memref<8x8x128xf32, #tpu.memory_space<vmem>>, vector<1x8x128xf32>
    %46 = vector.shape_cast %45 : vector<1x8x128xf32> to vector<8x128xf32>
    %47 = arith.addf %43, %46 : vector<8x128xf32>
    %48 = arith.index_cast %c1_i32 : i32 to index
    %c0_28 = arith.constant 0 : index
    %c0_29 = arith.constant 0 : index
    %49 = vector.load %arg8[%48, %c0_28, %c0_29] : memref<8x8x128xf32, #tpu.memory_space<vmem>>, vector<1x8x128xf32>
    %50 = vector.shape_cast %49 : vector<1x8x128xf32> to vector<8x128xf32>
    %51 = vector.shape_cast %47 : vector<8x128xf32> to vector<1x8x128xf32>
    tpu.vector_store %arg8[%48, %c0_28, %c0_29], %51 {strides = array<i32>} : memref<8x8x128xf32, #tpu.memory_space<vmem>>, vector<1x8x128xf32>,
    %c2_i32 = arith.constant 2 : i32
    %52 = arith.index_cast %c2_i32 : i32 to index
    %c0_30 = arith.constant 0 : index
    %c0_31 = arith.constant 0 : index
    %53 = vector.load %arg7[%52, %c0_30, %c0_31] : memref<8x8x128xf32, #tpu.memory_space<vmem>>, vector<1x8x128xf32>
    %54 = vector.shape_cast %53 : vector<1x8x128xf32> to vector<8x128xf32>
    %55 = arith.mulf %54, %47 : vector<8x128xf32>
    %56 = arith.index_cast %c2_i32 : i32 to index
    %c0_32 = arith.constant 0 : index
    %c0_33 = arith.constant 0 : index
    %57 = vector.load %arg8[%56, %c0_32, %c0_33] : memref<8x8x128xf32, #tpu.memory_space<vmem>>, vector<1x8x128xf32>
    %58 = vector.shape_cast %57 : vector<1x8x128xf32> to vector<8x128xf32>
    %59 = arith.addf %55, %58 : vector<8x128xf32>
    %60 = arith.index_cast %c2_i32 : i32 to index
    %c0_34 = arith.constant 0 : index
    %c0_35 = arith.constant 0 : index
    %61 = vector.load %arg8[%60, %c0_34, %c0_35] : memref<8x8x128xf32, #tpu.memory_space<vmem>>, vector<1x8x128xf32>
    %62 = vector.shape_cast %61 : vector<1x8x128xf32> to vector<8x128xf32>
    %63 = vector.shape_cast %59 : vector<8x128xf32> to vector<1x8x128xf32>
    tpu.vector_store %arg8[%60, %c0_34, %c0_35], %63 {strides = array<i32>} : memref<8x8x128xf32, #tpu.memory_space<vmem>>, vector<1x8x128xf32>,
    %c3_i32 = arith.constant 3 : i32
    %64 = arith.index_cast %c3_i32 : i32 to index
    %c0_36 = arith.constant 0 : index
    %c0_37 = arith.constant 0 : index
    %65 = vector.load %arg7[%64, %c0_36, %c0_37] : memref<8x8x128xf32, #tpu.memory_space<vmem>>, vector<1x8x128xf32>
    %66 = vector.shape_cast %65 : vector<1x8x128xf32> to vector<8x128xf32>
    %67 = arith.mulf %66, %59 : vector<8x128xf32>
    %68 = arith.index_cast %c3_i32 : i32 to index
    %c0_38 = arith.constant 0 : index
    %c0_39 = arith.constant 0 : index
    %69 = vector.load %arg8[%68, %c0_38, %c0_39] : memref<8x8x128xf32, #tpu.memory_space<vmem>>, vector<1x8x128xf32>
    %70 = vector.shape_cast %69 : vector<1x8x128xf32> to vector<8x128xf32>
    %71 = arith.addf %67, %70 : vector<8x128xf32>
    %72 = arith.index_cast %c3_i32 : i32 to index
    %c0_40 = arith.constant 0 : index
    %c0_41 = arith.constant 0 : index
    %73 = vector.load %arg8[%72, %c0_40, %c0_41] : memref<8x8x128xf32, #tpu.memory_space<vmem>>, vector<1x8x128xf32>
    %74 = vector.shape_cast %73 : vector<1x8x128xf32> to vector<8x128xf32>
    %75 = vector.shape_cast %71 : vector<8x128xf32> to vector<1x8x128xf32>
    tpu.vector_store %arg8[%72, %c0_40, %c0_41], %75 {strides = array<i32>} : memref<8x8x128xf32, #tpu.memory_space<vmem>>, vector<1x8x128xf32>,
    %c4_i32 = arith.constant 4 : i32
    %76 = arith.index_cast %c4_i32 : i32 to index
    %c0_42 = arith.constant 0 : index
    %c0_43 = arith.constant 0 : index
    %77 = vector.load %arg7[%76, %c0_42, %c0_43] : memref<8x8x128xf32, #tpu.memory_space<vmem>>, vector<1x8x128xf32>
    %78 = vector.shape_cast %77 : vector<1x8x128xf32> to vector<8x128xf32>
    %79 = arith.mulf %78, %71 : vector<8x128xf32>
    %80 = arith.index_cast %c4_i32 : i32 to index
    %c0_44 = arith.constant 0 : index
    %c0_45 = arith.constant 0 : index
    %81 = vector.load %arg8[%80, %c0_44, %c0_45] : memref<8x8x128xf32, #tpu.memory_space<vmem>>, vector<1x8x128xf32>
    %82 = vector.shape_cast %81 : vector<1x8x128xf32> to vector<8x128xf32>
    %83 = arith.addf %79, %82 : vector<8x128xf32>
    %84 = arith.index_cast %c4_i32 : i32 to index
    %c0_46 = arith.constant 0 : index
    %c0_47 = arith.constant 0 : index
    %85 = vector.load %arg8[%84, %c0_46, %c0_47] : memref<8x8x128xf32, #tpu.memory_space<vmem>>, vector<1x8x128xf32>
    %86 = vector.shape_cast %85 : vector<1x8x128xf32> to vector<8x128xf32>
    %87 = vector.shape_cast %83 : vector<8x128xf32> to vector<1x8x128xf32>
    tpu.vector_store %arg8[%84, %c0_46, %c0_47], %87 {strides = array<i32>} : memref<8x8x128xf32, #tpu.memory_space<vmem>>, vector<1x8x128xf32>,
    %c5_i32 = arith.constant 5 : i32
    %88 = arith.index_cast %c5_i32 : i32 to index
    %c0_48 = arith.constant 0 : index
    %c0_49 = arith.constant 0 : index
    %89 = vector.load %arg7[%88, %c0_48, %c0_49] : memref<8x8x128xf32, #tpu.memory_space<vmem>>, vector<1x8x128xf32>
    %90 = vector.shape_cast %89 : vector<1x8x128xf32> to vector<8x128xf32>
    %91 = arith.mulf %90, %83 : vector<8x128xf32>
    %92 = arith.index_cast %c5_i32 : i32 to index
    %c0_50 = arith.constant 0 : index
    %c0_51 = arith.constant 0 : index
    %93 = vector.load %arg8[%92, %c0_50, %c0_51] : memref<8x8x128xf32, #tpu.memory_space<vmem>>, vector<1x8x128xf32>
    %94 = vector.shape_cast %93 : vector<1x8x128xf32> to vector<8x128xf32>
    %95 = arith.addf %91, %94 : vector<8x128xf32>
    %96 = arith.index_cast %c5_i32 : i32 to index
    %c0_52 = arith.constant 0 : index
    %c0_53 = arith.constant 0 : index
    %97 = vector.load %arg8[%96, %c0_52, %c0_53] : memref<8x8x128xf32, #tpu.memory_space<vmem>>, vector<1x8x128xf32>
    %98 = vector.shape_cast %97 : vector<1x8x128xf32> to vector<8x128xf32>
    %99 = vector.shape_cast %95 : vector<8x128xf32> to vector<1x8x128xf32>
    tpu.vector_store %arg8[%96, %c0_52, %c0_53], %99 {strides = array<i32>} : memref<8x8x128xf32, #tpu.memory_space<vmem>>, vector<1x8x128xf32>,
    %c6_i32 = arith.constant 6 : i32
    %100 = arith.index_cast %c6_i32 : i32 to index
    %c0_54 = arith.constant 0 : index
    %c0_55 = arith.constant 0 : index
    %101 = vector.load %arg7[%100, %c0_54, %c0_55] : memref<8x8x128xf32, #tpu.memory_space<vmem>>, vector<1x8x128xf32>
    %102 = vector.shape_cast %101 : vector<1x8x128xf32> to vector<8x128xf32>
    %103 = arith.mulf %102, %95 : vector<8x128xf32>
    %104 = arith.index_cast %c6_i32 : i32 to index
    %c0_56 = arith.constant 0 : index
    %c0_57 = arith.constant 0 : index
    %105 = vector.load %arg8[%104, %c0_56, %c0_57] : memref<8x8x128xf32, #tpu.memory_space<vmem>>, vector<1x8x128xf32>
    %106 = vector.shape_cast %105 : vector<1x8x128xf32> to vector<8x128xf32>
    %107 = arith.addf %103, %106 : vector<8x128xf32>
    %108 = arith.index_cast %c6_i32 : i32 to index
    %c0_58 = arith.constant 0 : index
    %c0_59 = arith.constant 0 : index
    %109 = vector.load %arg8[%108, %c0_58, %c0_59] : memref<8x8x128xf32, #tpu.memory_space<vmem>>, vector<1x8x128xf32>
    %110 = vector.shape_cast %109 : vector<1x8x128xf32> to vector<8x128xf32>
    %111 = vector.shape_cast %107 : vector<8x128xf32> to vector<1x8x128xf32>
    tpu.vector_store %arg8[%108, %c0_58, %c0_59], %111 {strides = array<i32>} : memref<8x8x128xf32, #tpu.memory_space<vmem>>, vector<1x8x128xf32>,
    %c7_i32 = arith.constant 7 : i32
    %112 = arith.index_cast %c7_i32 : i32 to index
    %c0_60 = arith.constant 0 : index
    %c0_61 = arith.constant 0 : index
    %113 = vector.load %arg7[%112, %c0_60, %c0_61] : memref<8x8x128xf32, #tpu.memory_space<vmem>>, vector<1x8x128xf32>
    %114 = vector.shape_cast %113 : vector<1x8x128xf32> to vector<8x128xf32>
    %115 = arith.mulf %114, %107 : vector<8x128xf32>
    %116 = arith.index_cast %c7_i32 : i32 to index
    %c0_62 = arith.constant 0 : index
    %c0_63 = arith.constant 0 : index
    %117 = vector.load %arg8[%116, %c0_62, %c0_63] : memref<8x8x128xf32, #tpu.memory_space<vmem>>, vector<1x8x128xf32>
    %118 = vector.shape_cast %117 : vector<1x8x128xf32> to vector<8x128xf32>
    %119 = arith.addf %115, %118 : vector<8x128xf32>
    %120 = arith.index_cast %c7_i32 : i32 to index
    %c0_64 = arith.constant 0 : index
    %c0_65 = arith.constant 0 : index
    %121 = vector.load %arg8[%120, %c0_64, %c0_65] : memref<8x8x128xf32, #tpu.memory_space<vmem>>, vector<1x8x128xf32>
    %122 = vector.shape_cast %121 : vector<1x8x128xf32> to vector<8x128xf32>
    %123 = vector.shape_cast %119 : vector<8x128xf32> to vector<1x8x128xf32>
    tpu.vector_store %arg8[%120, %c0_64, %c0_65], %123 {strides = array<i32>} : memref<8x8x128xf32, #tpu.memory_space<vmem>>, vector<1x8x128xf32>,
    %c8_i32_66 = arith.constant 8 : i32
    %c0_67 = arith.constant 0 : index
    %c0_68 = arith.constant 0 : index
    %c0_69 = arith.constant 0 : index
    %124 = vector.load %arg8[%c0_67, %c0_68, %c0_69] : memref<8x8x128xf32, #tpu.memory_space<vmem>>, vector<8x8x128xf32>
    %125 = tpu.transpose %124, [1, 0, 2] : vector<8x8x128xf32> -> vector<8x8x128xf32>
    %c0_70 = arith.constant 0 : index
    %126 = arith.index_cast %6 : i32 to index
    %c0_71 = arith.constant 0 : index
    %127 = vector.load %arg6[%c0_70, %126, %c0_71] : memref<8x8x128xf32, #tpu.memory_space<vmem>>, vector<8x8x128xf32>
    tpu.vector_store %arg6[%c0_70, %126, %c0_71], %125 {strides = array<i32>} : memref<8x8x128xf32, #tpu.memory_space<vmem>>, vector<8x8x128xf32>,
    %c1_i32_72 = arith.constant 1 : i32
    %c0_73 = arith.constant 0 : index
    %c0_74 = arith.constant 0 : index
    %128 = vector.load %arg9[%c0_73, %c0_74] : memref<8x128xf32, #tpu.memory_space<vmem>>, vector<8x128xf32>
    tpu.vector_store %arg9[%c0_73, %c0_74], %119 {strides = array<i32>} : memref<8x128xf32, #tpu.memory_space<vmem>>, vector<8x128xf32>,
    return
  }
  func.func @transform_0(%arg0: i32, %arg1: i32) -> (i32, i32, i32) {
    %c0_i32 = arith.constant 0 : i32
    %c0_i32_0 = arith.constant 0 : i32
    return %arg0, %arg1, %c0_i32 : i32, i32, i32
  }
  func.func @transform_1(%arg0: i32, %arg1: i32) -> (i32, i32) {
    %c0_i32 = arith.constant 0 : i32
    %c0_i32_0 = arith.constant 0 : i32
    %c0_i32_1 = arith.constant 0 : i32
    return %c0_i32, %c0_i32_0 : i32, i32
  }
  func.func @transform_2(%arg0: i32, %arg1: i32) -> (i32, i32) {
    %c0_i32 = arith.constant 0 : i32
    %c0_i32_0 = arith.constant 0 : i32
    %c0_i32_1 = arith.constant 0 : i32
    return %c0_i32, %c0_i32_0 : i32, i32
  }
  func.func @transform_3(%arg0: i32, %arg1: i32) -> (i32, i32) {
    %c0_i32 = arith.constant 0 : i32
    %c0_i32_0 = arith.constant 0 : i32
    return %arg0, %c0_i32 : i32, i32
  }
  func.func @transform_4(%arg0: i32, %arg1: i32) -> (i32, i32, i32) {
    %c0_i32 = arith.constant 0 : i32
    %c0_i32_0 = arith.constant 0 : i32
    return %arg0, %arg1, %c0_i32 : i32, i32, i32
  }
}

</mosaic_0001>

<bundles_post_ra>
// kernel: tpu_custom_call.1
= control target key start
LH: loop header
LB: loop body
LE: loop exit
PB: predicated region body
PF: predicated region fallthrough
CT: control target
= control target key end

     0   :  { %9 = vsyncpa [#allocation6], 0  ;;  %s1098_s0 = inlined_call_operand.hbm [shape: f32[8,8,16], index: 0, kind: input, shape index: {}]   ;;  %s1099_s1 = inlined_call_operand.hbm [shape: f32[16,256], index: 1, kind: input, shape index: {}]   ;;  %s1100_s2 = inlined_call_operand.vmem [shape: f32[1,256], index: 2, kind: input, shape index: {}]   ;;  %s1101_s3 = inlined_call_operand.vmem [shape: f32[8,128], index: 3, kind: input, shape index: {}]   ;;  %s1102_s4 = inlined_call_operand.hbm [shape: f32[8,8,128], index: 4, kind: output, shape index: {}]  }
   0x1   :  { %10 = vsyncpa [#allocation9], 0 }
   0x2   :  { %11 = vsyncpa [#allocation7], 0  ;;  %s928_s15 = smov [#allocation5]   ;;  %s856_s19 = scalar_lea.hbm %s1098_s0, 1024 }
   0x3   :  { %s17_s16 = sshll.u32 %s928_s15, 4  ;;  %p857_p0 = scmp.ne.s32.totalorder %s1098_s0, %s856_s19  ;;  %s18_s16 = int_to_ptr.vmem [resolvable:$true] %s17_s16 }
   0x4   :  { %p860_p1 = scmp.lt.u32.totalorder %s856_s19, %s1098_s0 }
   0x6   :  { %p862_p2 = pnand %p860_p1, %p857_p0 }
   0x8   :  { %865 = shalt.err (!%p862_p2)
}
   0x9   :  { %s866_s24 = scalar_lea.vmem %s18_s16, 1024  ;;  %p871_p4 = scmp.lt.s32.totalorder %s18_s16, %s18_s16 }
   0xa   :  { %p867_p3 = scmp.ne.s32.totalorder %s18_s16, %s866_s24  ;;  %p872_p5 = scmp.lt.s32.totalorder %s866_s24, %s866_s24 }
   0xc   :  { %p873_p6 = por %p872_p5, %p871_p4 }
   0xe   :  { %p874_p7 = pnand %p873_p6, %p867_p3 }
  0x10   :  { %877 = shalt.err (!%p874_p7)
}
  0x11   :  { %s929_s25 = smov 128   ;;  %s930_s26 = smov 8  }
  0x12   :  { %23 = dma.hbm_to_vmem [thread:$0]  %s1098_s0, 1024, %s18_s16, [#allocation6], %s929_s25, %s929_s25, %s930_s26  }
  0x13   :  { %s931_s29 = smov [#allocation8]   ;;  %s878_s7 = scalar_lea.hbm %s1099_s1, 512 }
  0x14   :  { %s29_s30 = sshll.u32 %s931_s29, 4  ;;  %p879_p8 = scmp.ne.s32.totalorder %s1099_s1, %s878_s7  ;;  %s30_s30 = int_to_ptr.vmem [resolvable:$true] %s29_s30 }
  0x15   :  { %p882_p9 = scmp.lt.u32.totalorder %s878_s7, %s1099_s1 }
  0x17   :  { %p884_p10 = pnand %p882_p9, %p879_p8 }
  0x19   :  { %887 = shalt.err (!%p884_p10)
}
  0x1a   :  { %s888_s12 = scalar_lea.vmem %s30_s30, 512  ;;  %p893_p12 = scmp.lt.s32.totalorder %s30_s30, %s30_s30 }
  0x1b   :  { %p889_p11 = scmp.ne.s32.totalorder %s30_s30, %s888_s12  ;;  %p894_p13 = scmp.lt.s32.totalorder %s888_s12, %s888_s12 }
  0x1d   :  { %p895_p0 = por %p894_p13, %p893_p12 }
  0x1f   :  { %p896_p1 = pnand %p895_p0, %p889_p11 }
  0x21   :  { %899 = shalt.err (!%p896_p1)
}
  0x22   :  { %s932_s0 = smov 256   ;;  %s933_s13 = smov 16  }
  0x23   :  { %35 = dma.hbm_to_vmem [thread:$0]  %s1099_s1, 512, %s30_s30, [#allocation9], %s932_s0, %s932_s0, %s933_s13  }
  0x24   :  { %922 = dma.done.wait [#allocation6], 1024  }
  0x25   :  { %923 = vsyncadd [#allocation6], 4294966272 }
  0x26   :  { %924 = dma.done.wait [#allocation9], 512  }
  0x27   :  { %925 = vsyncadd [#allocation9], 4294966784  ;;  %v934_v0 = vmov 0.0   ;;  %v63_v1 = vld [vmem:[#allocation8 + $0x8] sm:$0xff]  ;;  %v65_v2 = vld [vmem:[#allocation8 + $0x18] sm:$0xff]  ;;  %vm77_vm0 = vcmask 130048   ;;  %v67_v15 = vlaneseq }
  0x28   :  { %166 = vmatprep.mubr.f32.mxu0 %v934_v0  ;;  %190 = vmatprep.mubr.f32.mxu1 %v934_v0  ;;  %v62_v3 = vld [vmem:[#allocation8] sm:$0xff]  ;;  %v808_v4 = vpack.c.bf16 %v65_v2, %v63_v1  ;;  %v64_v5 = vld [vmem:[#allocation8 + $0x10] sm:$0xff]  ;;  %v55_v9 = vld [vmem:[#allocation5 + $0x8] sm:$0xff]  ;;  %v935_v18 = vmov 1983009808  }
  0x29   :  { %v810_v6 = vpack.c.bf16 %v64_v5, %v62_v3  ;;  %v54_v7 = vld [vmem:[#allocation5] sm:$0xff]  ;;  %v59_v10 = vld [vmem:[#allocation5 + $0x28] sm:$0xff]  ;;  %v56_v11 = vld [vmem:[#allocation5 + $0x10] sm:$0xff]  ;;  %v68_v16 = vshrl.u32 %v67_v15, 7  ;;  %v218_v19 = vunpack.c.l.s4 %v935_v18  ;;  %v936_v27 = vmov 1934713408  }
  0x2a   :  { %809 = vmatprep.subr.bf16.mxu0 %v808_v4  ;;  %812 = vmatprep.subr.bf16.mxu1 %v808_v4  ;;  %v58_v8 = vld [vmem:[#allocation5 + $0x20] sm:$0xff]  ;;  %v60_v12 = vld [vmem:[#allocation5 + $0x30] sm:$0xff]  ;;  %v57_v13 = vld [vmem:[#allocation5 + $0x18] sm:$0xff]  ;;  %v282_v28 = vunpack.c.l.s4 %v936_v27 }
  0x2b   :  { %811 = vmatpush1.bf16.msra.mxu0 %v810_v6  ;;  %813 = vmatpush1.bf16.msra.mxu1 %v810_v6  ;;  %v61_v14 = vld [vmem:[#allocation5 + $0x38] sm:$0xff]  ;;  %v69_v21 = vsub.s32 0, %v68_v16  ;;  %v52_v24 = vld [vmem:[%s1100_s2] sm:$0x3]  ;;  %v73_v25 = vsub.s32 1, %v68_v16  ;;  %v219_v26 = vunpack.c.0.s8 %v218_v19 }
  0x2c   :  { %v283_v36 = vunpack.c.0.s8 %v282_v28 }
  0x2d   :  { %v70_v31 = vrot.slane %v52_v24, %v69_v21  ;;  %v74_v34 = vrot.slane %v52_v24, %v73_v25  ;;  %v1001_v35 = vsub.s32 %v219_v26, %v68_v16 }
  0x2e   :  { %792 = vmatmul.mubr.msk.f32.vlgmr.msra.gmra.mrb[0].mxu0 %vm77_vm0, %v54_v7  ;;  %796 = vmatmul.mubr.msk.f32.vlgmr.msra.gmra.mrb[0].mxu1 %vm77_vm0, %v58_v8  ;;  %v1011_v59 = vsub.s32 %v283_v36, %v68_v16 }
  0x2f   :  { %172 = vmatprep.mubr.f32.mxu0 %v934_v0  ;;  %196 = vmatprep.mubr.f32.mxu1 %v934_v0 }
  0x32   :  { %793 = vmatmul.mubr.msk.f32.gmra.mrb[2].mxu0 %vm77_vm0, %v55_v9  ;;  %797 = vmatmul.mubr.msk.f32.gmra.mrb[2].mxu1 %vm77_vm0, %v59_v10 }
  0x33   :  { %178 = vmatprep.mubr.f32.mxu0 %v934_v0  ;;  %202 = vmatprep.mubr.f32.mxu1 %v934_v0 }
  0x36   :  { %794 = vmatmul.mubr.msk.f32.gmra.mrb[4].mxu0 %vm77_vm0, %v56_v11  ;;  %798 = vmatmul.mubr.msk.f32.gmra.mrb[4].mxu1 %vm77_vm0, %v60_v12 }
  0x37   :  { %184 = vmatprep.mubr.f32.mxu0 %v934_v0  ;;  %208 = vmatprep.mubr.f32.mxu1 %v934_v0 }
  0x3a   :  { %795 = vmatmul.mubr.msk.f32.gmra.mrb[6].mxu0 %vm77_vm0, %v57_v13  ;;  %799 = vmatmul.mubr.msk.f32.gmra.mrb[6].mxu1 %vm77_vm0, %v61_v14 }
 0x101   :  { %v168_v17 = vpop.f32.mrb[0].mxu0  ;;  %v192_v20 = vpop.f32.mrb[0].mxu1 }
 0x102   :  { %v170_v22 = vpop.f32.mrb[1].mxu0  ;;  %v194_v23 = vpop.f32.mrb[1].mxu1  ;;  %v169_v39 = vadd.f32 %v168_v17, %v70_v31  ;;  %v193_v40 = vadd.f32 %v192_v20, %v70_v31 }
 0x103   :  { %v171_v45 = vadd.f32 %v170_v22, %v74_v34  ;;  %v1003_v46 = vadd.f32 %v194_v23, %v74_v34 }
 0x105   :  { %v174_v29 = vpop.f32.mrb[2].mxu0  ;;  %v198_v30 = vpop.f32.mrb[2].mxu1 }
 0x106   :  { %v176_v32 = vpop.f32.mrb[3].mxu0  ;;  %v200_v33 = vpop.f32.mrb[3].mxu1  ;;  %v175_v60 = vadd.f32 %v174_v29, %v70_v31  ;;  %v199_v61 = vadd.f32 %v198_v30, %v70_v31 }
 0x107   :  { %v177_v0 = vadd.f32 %v176_v32, %v74_v34  ;;  %v201_v1 = vadd.f32 %v200_v33, %v74_v34 }
 0x109   :  { %v180_v37 = vpop.f32.mrb[4].mxu0  ;;  %v204_v38 = vpop.f32.mrb[4].mxu1 }
 0x10a   :  { %v181_v41 = vadd.f32 %v180_v37, %v70_v31  ;;  %v205_v42 = vadd.f32 %v204_v38, %v70_v31  ;;  %v182_v43 = vpop.f32.mrb[5].mxu0  ;;  %v206_v44 = vpop.f32.mrb[5].mxu1 }
 0x10b   :  { %v183_v47 = vadd.f32 %v182_v43, %v74_v34  ;;  %v1005_v48 = vadd.f32 %v206_v44, %v74_v34 }
 0x10c   :  { %v215_v49 = vcombine.low %v169_v39, %v181_v41  ;;  %v216_v50 = vcombine.high %v169_v39, %v181_v41  ;;  %v247_v51 = vcombine.low %v193_v40, %v205_v42  ;;  %v248_v52 = vcombine.high %v193_v40, %v205_v42 }
 0x10d   :  { %v351_v53 = vcombine.low %v171_v45, %v183_v47  ;;  %v352_v54 = vcombine.high %v171_v45, %v183_v47  ;;  %v383_v55 = vcombine.low %v1003_v46, %v1005_v48  ;;  %v384_v56 = vcombine.high %v1003_v46, %v1005_v48  ;;  %v186_v57 = vpop.f32.mrb[6].mxu0  ;;  %v210_v58 = vpop.f32.mrb[6].mxu1 }
 0x10e   :  { %v188_v62 = vpop.f32.mrb[7].mxu0  ;;  %v212_v63 = vpop.f32.mrb[7].mxu1  ;;  %v223_v2 = vrot.slane %v215_v49, %v1001_v35  ;;  %v230_v3 = vrot.slane %v216_v50, %v1001_v35  ;;  %v187_v4 = vadd.f32 %v186_v57, %v70_v31  ;;  %v211_v5 = vadd.f32 %v210_v58, %v70_v31 }
 0x10f   :  { %v189_v6 = vadd.f32 %v188_v62, %v74_v34  ;;  %v213_v7 = vadd.f32 %v212_v63, %v74_v34  ;;  %v255_v8 = vrot.slane %v247_v51, %v1001_v35  ;;  %v262_v9 = vrot.slane %v248_v52, %v1001_v35 }
 0x110   :  { %v359_v10 = vrot.slane %v351_v53, %v1001_v35  ;;  %v1019_v11 = vrot.slane %v352_v54, %v1001_v35  ;;  %v231_v12 = vcombine.low %v175_v60, %v187_v4  ;;  %v232_v13 = vcombine.high %v175_v60, %v187_v4 }
 0x111   :  { %v263_v14 = vcombine.low %v199_v61, %v211_v5  ;;  %v264_v15 = vcombine.high %v199_v61, %v211_v5  ;;  %v367_v16 = vcombine.low %v177_v0, %v189_v6  ;;  %v368_v17 = vcombine.high %v177_v0, %v189_v6 }
 0x112   :  { %v399_v18 = vcombine.low %v201_v1, %v213_v7  ;;  %v400_v19 = vcombine.high %v201_v1, %v213_v7  ;;  %v239_v20 = vrot.slane %v231_v12, %v1001_v35  ;;  %v246_v21 = vrot.slane %v232_v13, %v1001_v35 }
 0x113   :  { %v271_v22 = vrot.slane %v263_v14, %v1001_v35  ;;  %v278_v23 = vrot.slane %v264_v15, %v1001_v35  ;;  %v391_v24 = vrot.slane %v383_v55, %v1001_v35  ;;  %v375_v25 = vrot.slane %v367_v16, %v1001_v35 }
 0x114   :  { %v382_v26 = vrot.slane %v368_v17, %v1001_v35  ;;  %v407_v27 = vrot.slane %v399_v18, %v1001_v35  ;;  %v279_v28 = vcombine.low %v223_v2, %v239_v20  ;;  %v280_v29 = vcombine.high %v223_v2, %v239_v20 }
 0x115   :  { %v295_v30 = vcombine.low %v230_v3, %v246_v21  ;;  %v296_v31 = vcombine.high %v230_v3, %v246_v21  ;;  %v311_v32 = vcombine.low %v255_v8, %v271_v22  ;;  %v312_v33 = vcombine.high %v255_v8, %v271_v22 }
 0x116   :  { %v327_v34 = vcombine.low %v262_v9, %v278_v23  ;;  %v328_v36 = vcombine.high %v262_v9, %v278_v23  ;;  %v287_v37 = vrot.slane %v279_v28, %v1011_v59  ;;  %v294_v38 = vrot.slane %v280_v29, %v1011_v59 }
 0x117   :  { %v303_v39 = vrot.slane %v295_v30, %v1011_v59  ;;  %v310_v40 = vrot.slane %v296_v31, %v1011_v59  ;;  %v319_v41 = vrot.slane %v311_v32, %v1011_v59  ;;  %v326_v42 = vrot.slane %v312_v33, %v1011_v59 }
 0x118   :  { %v335_v43 = vrot.slane %v327_v34, %v1011_v59  ;;  %v342_v44 = vrot.slane %v328_v36, %v1011_v59  ;;  %v415_v45 = vcombine.low %v359_v10, %v375_v25  ;;  %v416_v47 = vcombine.high %v359_v10, %v375_v25 }
 0x119   :  { %v431_v49 = vcombine.low %v1019_v11, %v382_v26  ;;  %v432_v50 = vcombine.high %v1019_v11, %v382_v26  ;;  %v343_v51 = vcombine.low %v287_v37, %v319_v41  ;;  %v344_v52 = vcombine.high %v287_v37, %v319_v41 }
 0x11a   :  { %v345_v53 = vcombine.low %v294_v38, %v326_v42  ;;  %v346_v54 = vcombine.high %v294_v38, %v326_v42  ;;  %v347_v55 = vcombine.low %v303_v39, %v335_v43  ;;  %v348_v57 = vcombine.high %v303_v39, %v335_v43  ;;  %v50_v42 = vld [vmem:[%s1101_s3] sm:$0xff]  ;;  %s937_s3 = smov [#allocation10]  }
 0x11b   :  { %v349_v58 = vcombine.low %v310_v40, %v342_v44  ;;  %v350_v60 = vcombine.high %v310_v40, %v342_v44  ;;  %v800_v61 = vmul.f32 -1.442695, %v343_v51  ;;  %v801_v62 = vmul.f32 -1.442695, %v344_v52  ;;  %s779_s18 = sshll.u32 %s937_s3, 4  ;;  %s780_s18 = int_to_ptr.vmem [resolvable:$true] %s779_s18 }
 0x11c   :  { %v802_v63 = vmul.f32 -1.442695, %v345_v53  ;;  %v414_v0 = vrot.slane %v400_v19, %v1001_v35  ;;  %v398_v1 = vrot.slane %v384_v56, %v1001_v35  ;;  %v803_v2 = vmul.f32 -1.442695, %v346_v54  ;;  %s900_s19 = scalar_lea.vmem %s780_s18, 1024  ;;  %p905_p3 = scmp.lt.s32.totalorder %s780_s18, %s780_s18 }
 0x11d   :  { %v804_v3 = vmul.f32 -1.442695, %v347_v55  ;;  %v423_v4 = vrot.slane %v415_v45, %v1011_v59  ;;  %824 = vpow2.f32 %v800_v61  ;;  %v805_v5 = vmul.f32 -1.442695, %v348_v57  ;;  %p901_p2 = scmp.ne.s32.totalorder %s780_s18, %s900_s19  ;;  %p906_p4 = scmp.lt.s32.totalorder %s900_s19, %s900_s19 }
 0x11e   :  { %v806_v6 = vmul.f32 -1.442695, %v349_v58  ;;  %v1046_v7 = vrot.slane %v416_v47, %v1011_v59  ;;  %826 = vpow2.f32 %v801_v62  ;;  %v807_v8 = vmul.f32 -1.442695, %v350_v60 }
 0x11f   :  { %v447_v9 = vcombine.low %v391_v24, %v407_v27  ;;  %v448_v10 = vcombine.high %v391_v24, %v407_v27  ;;  %828 = vpow2.f32 %v802_v63  ;;  %v1049_v11 = vrot.slane %v431_v49, %v1011_v59  ;;  %p907_p5 = por %p906_p4, %p905_p3 }
 0x120   :  { %v463_v46 = vcombine.low %v398_v1, %v414_v0  ;;  %v464_v48 = vcombine.high %v398_v1, %v414_v0  ;;  %830 = vpow2.f32 %v803_v2  ;;  %v1052_v56 = vrot.slane %v432_v50, %v1011_v59 }
 0x121   :  { %v455_v12 = vrot.slane %v447_v9, %v1011_v59  ;;  %v462_v13 = vrot.slane %v448_v10, %v1011_v59  ;;  %832 = vpow2.f32 %v804_v3  ;;  %p908_p6 = pnand %p907_p5, %p901_p2 }
 0x122   :  { %v471_v14 = vrot.slane %v463_v46, %v1011_v59  ;;  %v478_v15 = vrot.slane %v464_v48, %v1011_v59  ;;  %834 = vpow2.f32 %v805_v5 }
 0x123   :  { %v479_v16 = vcombine.low %v423_v4, %v455_v12  ;;  %v480_v17 = vcombine.high %v423_v4, %v455_v12  ;;  %v481_v18 = vcombine.low %v1046_v7, %v462_v13  ;;  %836 = vpow2.f32 %v806_v6 }
 0x124   :  { %v482_v19 = vcombine.high %v1046_v7, %v462_v13  ;;  %v483_v20 = vcombine.low %v1049_v11, %v471_v14  ;;  %v484_v21 = vcombine.high %v1049_v11, %v471_v14  ;;  %838 = vpow2.f32 %v807_v8 }
 0x125   :  { %v485_v22 = vcombine.low %v1052_v56, %v478_v15  ;;  %v486_v23 = vcombine.high %v1052_v56, %v478_v15 }
 0x127   :  { %v825_v24 = vpop.eup %824 }
 0x128   :  { %v827_v25 = vpop.eup %826  ;;  %v511_v26 = vadd.f32 1.0, %v825_v24 }
 0x129   :  { %v829_v27 = vpop.eup %828  ;;  %v512_v28 = vadd.f32 1.0, %v827_v25 }
 0x12a   :  { %v831_v29 = vpop.eup %830  ;;  %v513_v30 = vadd.f32 1.0, %v829_v27  ;;  %840 = vrcp.f32 %v511_v26 }
 0x12b   :  { %v833_v31 = vpop.eup %832  ;;  %v514_v32 = vadd.f32 1.0, %v831_v29  ;;  %842 = vrcp.f32 %v512_v28 }
 0x12c   :  { %v835_v33 = vpop.eup %834  ;;  %v515_v34 = vadd.f32 1.0, %v833_v31  ;;  %844 = vrcp.f32 %v513_v30 }
 0x12d   :  { %v837_v36 = vpop.eup %836  ;;  %v516_v37 = vadd.f32 1.0, %v835_v33  ;;  %846 = vrcp.f32 %v514_v32 }
 0x12e   :  { %v839_v38 = vpop.eup %838  ;;  %v517_v39 = vadd.f32 1.0, %v837_v36  ;;  %848 = vrcp.f32 %v515_v34 }
 0x12f   :  { %v518_v40 = vadd.f32 1.0, %v839_v38  ;;  %850 = vrcp.f32 %v516_v37 }
 0x130   :  { %852 = vrcp.f32 %v517_v39 }
 0x131   :  { %854 = vrcp.f32 %v518_v40 }
 0x134   :  { %v841_v41 = vpop.eup %840 }
 0x135   :  { %v843_v43 = vpop.eup %842  ;;  %v535_v44 = vsub.f32 1.0, %v841_v41  ;;  %v551_v45 = vmul.f32 %v841_v41, %v479_v16 }
 0x136   :  { %v845_v47 = vpop.eup %844  ;;  %v552_v49 = vmul.f32 %v843_v43, %v480_v17  ;;  %v536_v57 = vsub.f32 1.0, %v843_v43 }
 0x137   :  { %v847_v50 = vpop.eup %846  ;;  %v553_v51 = vmul.f32 %v845_v47, %v481_v18  ;;  %v568_v52 = vmul.f32 %v535_v44, %v50_v42  ;;  %v537_v3 = vsub.f32 1.0, %v845_v47 }
 0x138   :  { %v849_v53 = vpop.eup %848  ;;  %v554_v54 = vmul.f32 %v847_v50, %v482_v19  ;;  %v538_v6 = vsub.f32 1.0, %v847_v50 }
 0x139   :  { %v851_v55 = vpop.eup %850  ;;  %v555_v58 = vmul.f32 %v849_v53, %v483_v20  ;;  %v570_v60 = vadd.f32 %v568_v52, %v551_v45  ;;  %v539_v11 = vsub.f32 1.0, %v849_v53 }
 0x13a   :  { %v853_v61 = vpop.eup %852  ;;  %v556_v62 = vmul.f32 %v851_v55, %v484_v21  ;;  %v540_v13 = vsub.f32 1.0, %v851_v55 }
 0x13b   :  { %v855_v63 = vpop.eup %854  ;;  %v557_v0 = vmul.f32 %v853_v61, %v485_v22  ;;  %v574_v1 = vmul.f32 %v570_v60, %v536_v57  ;;  %v541_v24 = vsub.f32 1.0, %v853_v61 }
 0x13c   :  { %v558_v2 = vmul.f32 %v855_v63, %v486_v23  ;;  %v542_v27 = vsub.f32 1.0, %v855_v63 }
 0x13d   :  { %v577_v4 = vadd.f32 %v574_v1, %v552_v49 }
 0x13f   :  { %v581_v5 = vmul.f32 %v577_v4, %v537_v3 }
 0x141   :  { %v584_v7 = vadd.f32 %v581_v5, %v553_v51 }
 0x143   :  { %v588_v8 = vmul.f32 %v584_v7, %v538_v6  ;;  %v629_v9 = vcombine.low %v570_v60, %v584_v7  ;;  %v630_v10 = vcombine.high %v570_v60, %v584_v7 }
 0x145   :  { %v591_v46 = vadd.f32 %v588_v8, %v554_v54  ;;  %v637_v14 = vrot.slane %v629_v9, %v1001_v35  ;;  %v644_v16 = vrot.slane %v630_v10, %v1001_v35 }
 0x147   :  { %v595_v48 = vmul.f32 %v591_v46, %v539_v11  ;;  %v645_v56 = vcombine.low %v577_v4, %v591_v46  ;;  %v646_v12 = vcombine.high %v577_v4, %v591_v46 }
 0x149   :  { %v598_v15 = vadd.f32 %v595_v48, %v555_v58  ;;  %v653_v17 = vrot.slane %v645_v56, %v1001_v35  ;;  %v660_v18 = vrot.slane %v646_v12, %v1001_v35 }
 0x14b   :  { %v602_v19 = vmul.f32 %v598_v15, %v540_v13  ;;  %v693_v20 = vcombine.low %v637_v14, %v653_v17  ;;  %v694_v21 = vcombine.high %v637_v14, %v653_v17  ;;  %v709_v22 = vcombine.low %v644_v16, %v660_v18 }
 0x14c   :  { %v710_v23 = vcombine.high %v644_v16, %v660_v18 }
 0x14d   :  { %v605_v25 = vadd.f32 %v602_v19, %v556_v62  ;;  %v701_v44 = vrot.slane %v693_v20, %v1011_v59  ;;  %v708_v45 = vrot.slane %v694_v21, %v1011_v59 }
 0x14e   :  { %v724_v52 = vrot.slane %v710_v23, %v1011_v59 }
 0x14f   :  { %v609_v26 = vmul.f32 %v605_v25, %v541_v24 }
 0x151   :  { %v612_v28 = vadd.f32 %v609_v26, %v557_v0 }
 0x153   :  { %v616_v29 = vmul.f32 %v612_v28, %v542_v27  ;;  %v661_v30 = vcombine.low %v598_v15, %v612_v28  ;;  %v662_v31 = vcombine.high %v598_v15, %v612_v28 }
 0x155   :  { %v619_v32 = vadd.f32 %v616_v29, %v558_v2  ;;  %v669_v36 = vrot.slane %v661_v30, %v1001_v35  ;;  %v676_v37 = vrot.slane %v662_v31, %v1001_v35 }
 0x157   :  { %v677_v33 = vcombine.low %v605_v25, %v619_v32  ;;  %v678_v34 = vcombine.high %v605_v25, %v619_v32 }
 0x159   :  { %v685_v38 = vrot.slane %v677_v33, %v1001_v35  ;;  %v692_v39 = vrot.slane %v678_v34, %v1001_v35  ;;  %v717_v35 = vrot.slane %v709_v22, %v1011_v59 }
 0x15b   :  { %v725_v40 = vcombine.low %v669_v36, %v685_v38  ;;  %v726_v41 = vcombine.high %v669_v36, %v685_v38  ;;  %v741_v42 = vcombine.low %v676_v37, %v692_v39  ;;  %v742_v43 = vcombine.high %v676_v37, %v692_v39 }
 0x15d   :  { %v733_v47 = vrot.slane %v725_v40, %v1011_v59  ;;  %v740_v49 = vrot.slane %v726_v41, %v1011_v59  ;;  %v749_v50 = vrot.slane %v741_v42, %v1011_v59  ;;  %v756_v51 = vrot.slane %v742_v43, %v1011_v59 }
 0x15f   :  { %v757_v53 = vcombine.low %v701_v44, %v733_v47  ;;  %v758_v54 = vcombine.high %v701_v44, %v733_v47  ;;  %v759_v55 = vcombine.low %v708_v45, %v740_v49  ;;  %v760_v57 = vcombine.high %v708_v45, %v740_v49 }
 0x160   :  { %v761_v58 = vcombine.low %v717_v35, %v749_v50  ;;  %v762_v60 = vcombine.high %v717_v35, %v749_v50  ;;  %v763_v61 = vcombine.low %v724_v52, %v756_v51  ;;  %v764_v62 = vcombine.high %v724_v52, %v756_v51 }
 0x161   :  { %765 = vst [vmem:[#allocation10] sm:$0xff] %v757_v53  ;;  %766 = vst [vmem:[#allocation10 + $0x8] sm:$0xff] %v758_v54 }
 0x162   :  { %767 = vst [vmem:[#allocation10 + $0x10] sm:$0xff] %v759_v55  ;;  %768 = vst [vmem:[#allocation10 + $0x18] sm:$0xff] %v760_v57 }
 0x163   :  { %769 = vst [vmem:[#allocation10 + $0x20] sm:$0xff] %v761_v58  ;;  %770 = vst [vmem:[#allocation10 + $0x28] sm:$0xff] %v762_v60 }
 0x164   :  { %771 = vst [vmem:[#allocation10 + $0x30] sm:$0xff] %v763_v61  ;;  %772 = vst [vmem:[#allocation10 + $0x38] sm:$0xff] %v764_v62 }
 0x165   :  { %911 = shalt.err (!%p908_p6)
}
 0x166   :  { %s912_s22 = scalar_lea.hbm %s1102_s4, 1024 }
 0x167   :  { %p913_p7 = scmp.ne.s32.totalorder %s1102_s4, %s912_s22  ;;  %p916_p8 = scmp.lt.u32.totalorder %s912_s22, %s1102_s4 }
 0x169   :  { %p918_p9 = pnand %p916_p8, %p913_p7 }
 0x16b   :  { %921 = shalt.err (!%p918_p9)
}
 0x16c   :  { %785 = dma.vmem_to_hbm [thread:$0]  %s780_s18, 1024, %s1102_s4, [#allocation7], %s929_s25, %s929_s25, %s930_s26  }
 0x16d   :  { %926 = dma.done.wait [#allocation7], 1024  }
 0x16e   :  { %927 = vsyncadd [#allocation7], 4294966272 }
 0x16f   :  { %789 = vsyncpa [#allocation6], 1 }
 0x170   :  { %790 = vsyncpa [#allocation9], 1 }
 0x171   :  { %791 = vsyncpa [#allocation7], 1 }

</bundles_post_ra>
